<compile_context>
chip_gen: v5e
topology: v5e:2x2
jax: 0.10.0
libtpu: 0.0.40
codegen_flags: <defaults>
</compile_context>

<pallas_src>
import functools

import jax
import jax.numpy as jnp
from jax import lax
from jax.experimental import pallas as pl
from jax.experimental.pallas import tpu as pltpu

_EPS = 1e-8          # PyTorch nn.CosineSimilarity default eps
_EPS2 = _EPS * _EPS  # PyTorch clamps the *product* of squared norms at eps^2


def _round_up(n: int, m: int) -> int:
    return ((n + m - 1) // m) * m


def _choose_tb(B: int, D: int, elem_bytes: int) -> int:
    """Batch tile size (multiple of 8) whose double-buffered inputs fit VMEM."""
    # 2 inputs x 2 pipeline buffers x (TB * D * elem_bytes) <= ~12 MiB keeps us
    # under the default scoped-VMEM limit on every generation (v5e: 16 MiB).
    budget = 12 * 1024 * 1024
    per_row = 4 * D * elem_bytes
    tb = budget // max(per_row, 1)
    tb = int(min(1024, max(8, tb)))
    tb = (tb // 8) * 8
    b_pad = _round_up(B, 8)
    return max(8, min(tb, b_pad))


# ---------------------------------------------------------------------------
# Kernels
# ---------------------------------------------------------------------------

def _cos_pair_kernel(inv_temp, x_ref, y_ref, o_ref):
    # x_ref, y_ref: (TB, D) tiles in VMEM; o_ref: (1, TB) lane-dense output row.
    x = x_ref[...].astype(jnp.float32)
    y = y_ref[...].astype(jnp.float32)

    dot = jnp.sum(x * y, axis=-1)        # (TB,)   XLU cross-lane reduce
    sx = jnp.sum(x * x, axis=-1)         # (TB,)
    sy = jnp.sum(y * y, axis=-1)         # (TB,)

    denom = jnp.maximum(sx * sy, _EPS2)  # PyTorch eps semantics
    out = dot * lax.rsqrt(denom) * inv_temp
    o_ref[...] = out.reshape(o_ref.shape)


def _cos_row_vs_all_kernel(inv_temp, xi_ref, x_ref, o_ref):
    # xi_ref: (1, D) shared row; x_ref: (TB, D); o_ref: (1, TB).
    xi = xi_ref[...].astype(jnp.float32)   # (1, D) — broadcast inside kernel
    x = x_ref[...].astype(jnp.float32)     # (TB, D)

    dot = jnp.sum(x * xi, axis=-1)         # (TB,)
    sx = jnp.sum(x * x, axis=-1)           # (TB,)
    si = jnp.sum(xi * xi, axis=-1)         # (1,)  — negligible vs TB*D work

    denom = jnp.maximum(sx * si, _EPS2)
    out = dot * lax.rsqrt(denom) * inv_temp
    o_ref[...] = out.reshape(o_ref.shape)


# ---------------------------------------------------------------------------
# pallas_call drivers (2-D inputs)
# ---------------------------------------------------------------------------

def _cos_pair(x, y, temp, block_rows):
    B, D = x.shape
    elem_bytes = jnp.dtype(x.dtype).itemsize
    tb = block_rows if block_rows is not None else _choose_tb(B, D, elem_bytes)
    b_pad = _round_up(B, tb)
    if b_pad != B:
        pad = ((0, b_pad - B), (0, 0))
        x = jnp.pad(x, pad)
        y = jnp.pad(y, pad)
    n_tiles = b_pad // tb
    inv_temp = 1.0 / float(temp)

    out = pl.pallas_call(
        functools.partial(_cos_pair_kernel, inv_temp),
        out_shape=jax.ShapeDtypeStruct((n_tiles, tb), jnp.float32),
        grid_spec=pltpu.PrefetchScalarGridSpec(
            num_scalar_prefetch=0,
            grid=(n_tiles,),
            in_specs=[
                pl.BlockSpec((tb, D), lambda b: (b, 0)),
                pl.BlockSpec((tb, D), lambda b: (b, 0)),
            ],
            out_specs=pl.BlockSpec((1, tb), lambda b: (b, 0)),
        ),
        compiler_params=pltpu.CompilerParams(
            dimension_semantics=("parallel",),
            vmem_limit_bytes=32 * 1024 * 1024,
        ),
        cost_estimate=pl.CostEstimate(
            flops=6 * b_pad * D,
            transcendentals=b_pad,
            bytes_accessed=2 * b_pad * D * elem_bytes + 4 * b_pad,
        ),
    )(x, y)

    return out.reshape(b_pad)[:B]


def _cos_row_vs_all(xi, x, temp, block_rows):
    # xi: (1, D) shared row; x: (B, D).
    B, D = x.shape
    elem_bytes = jnp.dtype(x.dtype).itemsize
    tb = block_rows if block_rows is not None else _choose_tb(B, D, elem_bytes)
    b_pad = _round_up(B, tb)
    if b_pad != B:
        x = jnp.pad(x, ((0, b_pad - B), (0, 0)))
    n_tiles = b_pad // tb
    inv_temp = 1.0 / float(temp)

    out = pl.pallas_call(
        functools.partial(_cos_row_vs_all_kernel, inv_temp),
        out_shape=jax.ShapeDtypeStruct((n_tiles, tb), jnp.float32),
        grid_spec=pltpu.PrefetchScalarGridSpec(
            num_scalar_prefetch=0,
            grid=(n_tiles,),
            in_specs=[
                pl.BlockSpec((1, D), lambda b: (0, 0)),    # constant block: fetched once
                pl.BlockSpec((tb, D), lambda b: (b, 0)),
            ],
            out_specs=pl.BlockSpec((1, tb), lambda b: (b, 0)),
        ),
        compiler_params=pltpu.CompilerParams(
            dimension_semantics=("parallel",),
            vmem_limit_bytes=32 * 1024 * 1024,
        ),
        cost_estimate=pl.CostEstimate(
            flops=6 * b_pad * D,
            transcendentals=b_pad,
            bytes_accessed=(b_pad * D + D) * elem_bytes + 4 * b_pad,
        ),
    )(xi, x)

    return out.reshape(b_pad)[:B]


# ---------------------------------------------------------------------------
# Public wrappers (module semantics)
# ---------------------------------------------------------------------------

def cos_similarity(x: jax.Array, y: jax.Array, temp: float = 1.0,
                   block_rows: int | None = None) -> jax.Array:
    """Cos(temp)(x, y): cosine similarity over dim=-1, divided by temp."""
    x = jnp.asarray(x)
    y = jnp.asarray(y)
    assert x.shape[-1] == y.shape[-1], "last (feature) dims must match"
    D = x.shape[-1]
    out_lead = jnp.broadcast_shapes(x.shape[:-1], y.shape[:-1])

    x2 = x.reshape(-1, D)
    y2 = y.reshape(-1, D)
    if x2.shape[0] == y2.shape[0]:
        out = _cos_pair(x2, y2, temp, block_rows)
    elif x2.shape[0] == 1:
        out = _cos_row_vs_all(x2, y2, temp, block_rows)   # no HBM broadcast
    elif y2.shape[0] == 1:
        out = _cos_row_vs_all(y2, x2, temp, block_rows)
    else:
        xb = jnp.broadcast_to(x, out_lead + (D,)).reshape(-1, D)
        yb = jnp.broadcast_to(y, out_lead + (D,)).reshape(-1, D)
        out = _cos_pair(xb, yb, temp, block_rows)
    return out.reshape(out_lead)


def one_vs_all(x: jax.Array, i: int, temp: float = 1.0,
               block_rows: int | None = None) -> jax.Array:
    """Cos.one_vs_all: cosine(x[i:i+1], x) / temp -> [B]."""
    x = jnp.asarray(x)
    assert x.ndim == 2
    _, D = x.shape
    xi = lax.dynamic_slice(x, (i, 0), (1, D))   # single row; broadcast in-kernel
    return _cos_row_vs_all(xi, x, temp, block_rows)


# ---------------------------------------------------------------------------
# Self-test
# ---------------------------------------------------------------------------

def _ref_cos(x, y, temp):
    """Exact PyTorch nn.CosineSimilarity semantics (clamp product of sq-norms)."""
    x = x.astype(jnp.float32)
    y = y.astype(jnp.float32)
    dot = jnp.sum(x * y, axis=-1)
    w1 = jnp.sum(x * x, axis=-1)
    w2 = jnp.sum(y * y, axis=-1)
    return dot / jnp.sqrt(jnp.maximum(w1 * w2, _EPS2)) / temp


if __name__ == "__main__":
    key = jax.random.PRNGKey(0)
    kx, ky, kz = jax.random.split(key, 3)
    temp = 0.5

    # Case 1: small, single tile (f32).
    B, D = 8, 32
    x = jax.random.normal(kx, (B, D), dtype=jnp.float32)
    y = jax.random.normal(ky, (B, D), dtype=jnp.float32)
    out = jax.block_until_ready(cos_similarity(x, y, temp=temp))
    ref = _ref_cos(x, y, temp)
    assert out.shape == (B,)
    assert jnp.allclose(out, ref, atol=1e-5, rtol=1e-5)

    # Case 2: multi-tile grid with batch padding (B=20 -> padded to 24, TB=8).
    B2, D2 = 20, 128
    x2 = jax.random.normal(kz, (B2, D2), dtype=jnp.float32)
    y2 = jax.random.normal(kx, (B2, D2), dtype=jnp.float32)
    out2 = jax.block_until_ready(cos_similarity(x2, y2, temp=temp, block_rows=8))
    ref2 = _ref_cos(x2, y2, temp)
    assert out2.shape == (B2,)
    assert jnp.allclose(out2, ref2, atol=1e-5, rtol=1e-5)

    # Case 3: bf16 inputs (cast to f32 inside the kernel).
    xb = x2.astype(jnp.bfloat16)
    yb = y2.astype(jnp.bfloat16)
    out3 = jax.block_until_ready(cos_similarity(xb, yb, temp=temp))
    ref3 = _ref_cos(xb, yb, temp)
    assert jnp.allclose(out3, ref3, atol=2e-2, rtol=2e-2)

    # Case 4: broadcast (1, D) vs (B, D) through the generic entry point.
    out4 = jax.block_until_ready(cos_similarity(x[2:3], x, temp=temp))
    ref4 = _ref_cos(jnp.broadcast_to(x[2:3], (B, D)), x, temp)
    assert out4.shape == (B,)
    assert jnp.allclose(out4, ref4, atol=1e-5, rtol=1e-5)

    # Case 5: one_vs_all path (row 2 vs all rows).
    ova = jax.block_until_ready(one_vs_all(x, 2, temp=temp))
    assert ova.shape == (B,)
    assert jnp.allclose(ova, ref4, atol=1e-5, rtol=1e-5)

    print("KERNEL_OK")
</pallas_src>

<mosaic_0001>
module attributes {stable_mosaic.version = 11 : i64} {
  func.func @_cos_pair_kernel(%arg0: i32, %arg1: memref<8x32xf32, #tpu.memory_space<vmem>>, %arg2: memref<8x32xf32, #tpu.memory_space<vmem>>, %arg3: memref<1x8xf32, #tpu.memory_space<vmem>>) attributes {dimension_semantics = [#tpu.dimension_semantics<parallel>], iteration_bounds = array<i64: 1>, scalar_prefetch = 0 : i64, scratch_operands = 0 : i64, tpu.core_type = #tpu.core_type<tc>, window_params = [{transform_indices = @transform_0, window_bounds = array<i64: 8, 32>}, {transform_indices = @transform_1, window_bounds = array<i64: 8, 32>}, {transform_indices = @transform_2, window_bounds = array<i64: 1, 8>}]} {
    %c0 = arith.constant 0 : index
    %c0_0 = arith.constant 0 : index
    %0 = vector.load %arg1[%c0, %c0_0] : memref<8x32xf32, #tpu.memory_space<vmem>>, vector<8x32xf32>
    %c0_1 = arith.constant 0 : index
    %c0_2 = arith.constant 0 : index
    %1 = vector.load %arg2[%c0_1, %c0_2] : memref<8x32xf32, #tpu.memory_space<vmem>>, vector<8x32xf32>
    %2 = arith.mulf %0, %1 : vector<8x32xf32>
    %cst = arith.constant dense<0.000000e+00> : vector<8xf32>
    %3 = vector.multi_reduction <add>, %2, %cst [1] : vector<8x32xf32> to vector<8xf32>
    %4 = arith.mulf %0, %0 : vector<8x32xf32>
    %cst_3 = arith.constant dense<0.000000e+00> : vector<8xf32>
    %5 = vector.multi_reduction <add>, %4, %cst_3 [1] : vector<8x32xf32> to vector<8xf32>
    %6 = arith.mulf %1, %1 : vector<8x32xf32>
    %cst_4 = arith.constant dense<0.000000e+00> : vector<8xf32>
    %7 = vector.multi_reduction <add>, %6, %cst_4 [1] : vector<8x32xf32> to vector<8xf32>
    %8 = arith.mulf %5, %7 : vector<8xf32>
    %cst_5 = arith.constant 1.000000e-16 : f32
    %9 = vector.broadcast %cst_5 : f32 to vector<8xf32>
    %10 = arith.maximumf %8, %9 : vector<8xf32>
    %11 = math.rsqrt %10 : vector<8xf32>
    %12 = arith.mulf %3, %11 : vector<8xf32>
    %cst_6 = arith.constant 2.000000e+00 : f32
    %13 = vector.broadcast %cst_6 : f32 to vector<8xf32>
    %14 = arith.mulf %12, %13 : vector<8xf32>
    %15 = vector.shape_cast %14 : vector<8xf32> to vector<1x8xf32>
    %c0_7 = arith.constant 0 : index
    %c0_8 = arith.constant 0 : index
    %16 = vector.load %arg3[%c0_7, %c0_8] : memref<1x8xf32, #tpu.memory_space<vmem>>, vector<1x8xf32>
    tpu.vector_store %arg3[%c0_7, %c0_8], %15 {strides = array<i32>} : memref<1x8xf32, #tpu.memory_space<vmem>>, vector<1x8xf32>,
    return
  }
  func.func @transform_0(%arg0: i32) -> (i32, i32) {
    %c0_i32 = arith.constant 0 : i32
    %c0_i32_0 = arith.constant 0 : i32
    return %arg0, %c0_i32 : i32, i32
  }
  func.func @transform_1(%arg0: i32) -> (i32, i32) {
    %c0_i32 = arith.constant 0 : i32
    %c0_i32_0 = arith.constant 0 : i32
    return %arg0, %c0_i32 : i32, i32
  }
  func.func @transform_2(%arg0: i32) -> (i32, i32) {
    %c0_i32 = arith.constant 0 : i32
    %c0_i32_0 = arith.constant 0 : i32
    return %arg0, %c0_i32 : i32, i32
  }
}

</mosaic_0001>

<bundles_post_ra>
// kernel: tpu_custom_call.1
= control target key start
LH: loop header
LB: loop body
LE: loop exit
PB: predicated region body
PF: predicated region fallthrough
CT: control target
= control target key end

     0   :  { %7 = vsyncpa [#allocation3], 0  ;;  %s204_s0 = inlined_call_operand.hbm [shape: f32[8,32], index: 0, kind: input, shape index: {}]   ;;  %s205_s1 = inlined_call_operand.hbm [shape: f32[8,32], index: 1, kind: input, shape index: {}]   ;;  %s206_s2 = inlined_call_operand.hbm [shape: f32[1,8], index: 2, kind: output, shape index: {}]  }
   0x1   :  { %8 = vsyncpa [#allocation6], 0 }
   0x2   :  { %9 = vsyncpa [#allocation4], 0  ;;  %s15_s11 = sshll.u32 %s204_s0, 4  ;;  %s177_s12 = smov [#allocation2]   ;;  %s16_s11 = int_to_ptr.hbm [resolvable:$true] %s15_s11 }
   0x3   :  { %s17_s13 = sshll.u32 %s177_s12, 4  ;;  %s26_s16 = sshll.u32 %s205_s1, 4  ;;  %s18_s13 = int_to_ptr.vmem [resolvable:$true] %s17_s13  ;;  %s27_s16 = int_to_ptr.hbm [resolvable:$true] %s26_s16 }
   0x4   :  { %20 = dma.hbm_to_vmem [thread:$0]  %s16_s11, 128, %s18_s13, [#allocation3]  }
   0x5   :  { %s178_s17 = smov [#allocation5]  }
   0x6   :  { %s28_s18 = sshll.u32 %s178_s17, 4  ;;  %s29_s18 = int_to_ptr.vmem [resolvable:$true] %s28_s18 }
   0x7   :  { %31 = dma.hbm_to_vmem [thread:$0]  %s27_s16, 128, %s29_s18, [#allocation6]  }
   0x8   :  { %171 = dma.done.wait [#allocation3], 128  }
   0x9   :  { %172 = vsyncadd [#allocation3], 4294967168 }
   0xa   :  { %173 = dma.done.wait [#allocation6], 128  }
   0xb   :  { %174 = vsyncadd [#allocation6], 4294967168  ;;  %v40_v0 = vld [vmem:[#allocation2] sm:$0xff]  ;;  %vm43_vm0 = vcmask 261120   ;;  %v41_v1 = vld [vmem:[#allocation5] sm:$0xff]  ;;  %v70_v17 = vlaneseq  ;;  %s179_s0 = smov [#allocation7]  }
   0xc   :  { %v47_v2 = vmul.f32 %v40_v0, %v40_v0  ;;  %v42_v3 = vmul.f32 %v41_v1, %v40_v0  ;;  %v51_v6 = vmul.f32 %v41_v1, %v41_v1  ;;  %s81_s1 = sshll.u32 %s179_s0, 4  ;;  %s83_s21 = sshll.u32 %s206_s2, 4  ;;  %vm74_vm4 = vcmask 57344   ;;  %s82_s1 = int_to_ptr.vmem [resolvable:$true] %s81_s1  ;;  %s84_s21 = int_to_ptr.hbm [resolvable:$true] %s83_s21 }
   0xd   :  { %v71_v21 = vand.u32 127, %v70_v17 }
   0xe   :  { %v48_v4 = vsel %vm43_vm0, %v47_v2, 0.0  ;;  %v44_v5 = vsel %vm43_vm0, %v42_v3, 0.0  ;;  %v52_v7 = vsel %vm43_vm0, %v51_v6, 0.0 }
   0xf   :  { %49 = vadd.xlane.f32.xlu0 %v48_v4  ;;  %45 = vadd.xlane.f32.xlu1 %v44_v5 }
  0x17   :  { %53 = vadd.xlane.f32.xlu0 %v52_v7 }
  0x82   :  { %v50_v8 = vpop.xlane.xlu0 %49  ;;  %v46_v19 = vpop.xlane.xlu1 %45 }
  0x8a   :  { %v54_v9 = vpop.xlane.xlu0 %53 }
  0x8b   :  { %v55_v10 = vmul.f32 %v54_v9, %v50_v8 }
  0x8d   :  { %v56_v11 = vmax.f32 %v55_v10, 1e-16 }
  0x8f   :  { %97 = vrsqrt.f32 %v56_v11  ;;  %vm63_vm2 = vweird.f32 %v56_v11 }
  0x95   :  { %v98_v12 = vpop.eup %97 }
  0x96   :  { %v58_v13 = vmul.f32 %v98_v12, %v56_v11  ;;  %vm64_vm1 = vweird.f32 %v98_v12 }
  0x97   :  { %vm65_vm3 = vmor %vm63_vm2, %vm64_vm1 }
  0x98   :  { %v59_v14 = vmul.f32 %v98_v12, %v58_v13 }
  0x9a   :  { %v60_v15 = vmul.f32 0.5, %v59_v14 }
  0x9c   :  { %v61_v16 = vsub.f32 1.5, %v60_v15 }
  0x9e   :  { %v62_v18 = vmul.f32 %v98_v12, %v61_v16 }
  0xa0   :  { %v66_v20 = vsel %vm65_vm3, %v98_v12, %v62_v18 }
  0xa1   :  { %v67_v22 = vmul.f32 %v66_v20, %v46_v19 }
  0xa3   :  { %v68_v23 = vmul.f32 2.0, %v67_v22 }
  0xa5   :  { %v72_v24 = vperm.slane %v68_v23, %v71_v21 }
  0xa7   :  { %75 = vst.msk [vmem:[#allocation7] sm:$0x1] %vm74_vm4, %v72_v24 }
  0xa8   :  { %86 = dma.vmem_to_hbm [thread:$0]  %s82_s1, 16, %s84_s21, [#allocation4]  }
  0xa9   :  { %175 = dma.done.wait [#allocation4], 16  }
  0xaa   :  { %176 = vsyncadd [#allocation4], 4294967280 }
  0xab   :  { %91 = vsyncpa [#allocation3], 1 }
  0xac   :  { %92 = vsyncpa [#allocation6], 1 }
  0xad   :  { %93 = vsyncpa [#allocation4], 1 }

</bundles_post_ra>
